<compile_context>
chip_gen: v7x
topology: tpu7x:2x2x1
jax: 0.10.0
libtpu: 0.0.40
codegen_flags: <defaults>
</compile_context>

<pallas_src>
import jax
import jax.numpy as jnp
from jax.experimental import pallas as pl
from jax.experimental.pallas import tpu as pltpu

_LANES = 128
_SUBLANES = 8
_MIN_TILE_ROWS = _LANES * _SUBLANES   # 1024 rows: keeps (TR, 128) (8,128)-aligned
_MAX_TILE_ROWS = 262144               # v6e-class ceiling (30 MiB double-buffered f32)
_NUM_IN = 10
_NUM_OUT = 5


def _round_up(a, b):
    return (a + b - 1) // b * b


def _vmem_capacity_bytes():
    """Physical VMEM of the current TPU generation (conservative fallback)."""
    try:
        info = pltpu.get_tpu_info()
        cap = getattr(info, "vmem_capacity_bytes", None)
        if cap:
            return int(cap)
    except Exception:
        pass
    return 64 << 20  # assume the smallest (v7x-sized) VMEM if the query fails


def _pick_tile_rows(n_rows, in_dtype, out_dtype):
    """Generation-aware rows-per-grid-step."""
    bytes_per_row = (_NUM_IN * jnp.dtype(in_dtype).itemsize
                     + _NUM_OUT * jnp.dtype(out_dtype).itemsize)
    # Double-buffered in+out footprint may use ~1/4 of physical VMEM:
    # ~16 MiB/TC on v7x (64 MiB), ~32 MiB on v5e/v6e (128 MiB).
    budget = _vmem_capacity_bytes() // 4
    cap = (budget // (2 * bytes_per_row)) // _MIN_TILE_ROWS * _MIN_TILE_ROWS
    cap = max(_MIN_TILE_ROWS, min(cap, _MAX_TILE_ROWS))
    # Prefer >= ~16 uniform grid steps (keeps both v7x TCs fed via the
    # "parallel" axis and hides the fixed per-step pipeline overhead).
    target = _round_up(pl.cdiv(n_rows, 16), _MIN_TILE_ROWS)
    return max(_MIN_TILE_ROWS, min(cap, target))


def _majority_kernel(x_ref, o_ref):
    # x_ref: (10, TR, 128) channel-major block; o_ref: (5, TR, 128) block.
    f32 = jnp.float32
    # Plane-by-plane loads: no full 10-plane f32 temporary (matters for
    # bf16/int inputs) and shorter vreg live ranges at TR = 1024+.
    b0 = x_ref[0].astype(f32) + x_ref[4].astype(f32)
    b1 = x_ref[1].astype(f32) + x_ref[5].astype(f32)
    b2 = x_ref[2].astype(f32) + x_ref[6].astype(f32)
    b3 = x_ref[3].astype(f32) + x_ref[7].astype(f32)
    d = x_ref[8].astype(f32) + x_ref[9].astype(f32)

    # Pairwise max tree over the 5 classes -> pure VPU elementwise, no XLU.
    m = jnp.maximum(jnp.maximum(jnp.maximum(b0, b1), jnp.maximum(b2, b3)), d)

    # Numerically-stable softmax; exp on dense vregs (EUP slot).
    ed = jnp.exp(d - m)
    e0 = jnp.exp(b0 - m)
    e1 = jnp.exp(b1 - m)
    e2 = jnp.exp(b2 - m)
    e3 = jnp.exp(b3 - m)
    s = ((ed + e0) + (e1 + e2)) + e3

    # EUP reciprocal + one Newton step (2 cheap VPU ops) for ~f32 accuracy.
    inv = pl.reciprocal(s, approx=True)
    inv = inv * (2.0 - s * inv)

    od = o_ref.dtype
    # Class order matches torch.concat([d, b], -1): deletion first, then bases.
    o_ref[0] = (ed * inv).astype(od)
    o_ref[1] = (e0 * inv).astype(od)
    o_ref[2] = (e1 * inv).astype(od)
    o_ref[3] = (e2 * inv).astype(od)
    o_ref[4] = (e3 * inv).astype(od)


def majority_channel_major(x3, *, tile_rows=None, out_dtype=None):
    """Preferred high-performance I/O contract (no relayout cost).

    x3:  (10, NR, 128) channel-major, lane-dense count planes (NR*128 rows;
         NR must be a multiple of 8).
    out: (5, NR, 128) softmax probabilities in the same layout
         (class 0 = deletion, classes 1..4 = bases).
    """
    C, NR, L = x3.shape
    if C != _NUM_IN or L != _LANES:
        raise ValueError("expected a (10, NR, 128) channel-major input")
    if NR % _SUBLANES != 0:
        raise ValueError("NR (= rows / 128) must be a multiple of 8")

    if out_dtype is None:
        out_dtype = x3.dtype if jnp.issubdtype(x3.dtype, jnp.floating) else jnp.float32
    out_dtype = jnp.dtype(out_dtype)

    n_rows = NR * _LANES
    if tile_rows is None:
        tile_rows = _pick_tile_rows(n_rows, x3.dtype, out_dtype)
    tile_rows = _round_up(max(int(tile_rows), _MIN_TILE_ROWS), _MIN_TILE_ROWS)

    # Uniform, (8,128)-aligned tiles that divide NR exactly.
    TR = min(tile_rows // _LANES, NR)
    TR = max(_SUBLANES, TR - TR % _SUBLANES)
    while NR % TR != 0:
        TR -= _SUBLANES
    grid = (NR // TR,)

    in_item = jnp.dtype(x3.dtype).itemsize
    out_item = out_dtype.itemsize
    block_bytes = TR * _LANES * (_NUM_IN * in_item + _NUM_OUT * out_item)
    # Cover the double-buffered in+out footprint with ~25% headroom; stay well
    # under v7x's 64 MiB physical VMEM (our tile cap already guarantees this).
    vmem_limit = max(32 << 20, int(2.5 * block_bytes))

    cost = pl.CostEstimate(
        flops=26 * n_rows,                 # adds/maxes/subs/muls per row
        transcendentals=6 * n_rows,        # 5x exp + 1x approx reciprocal
        bytes_accessed=n_rows * (_NUM_IN * in_item + _NUM_OUT * out_item),
    )

    return pl.pallas_call(
        _majority_kernel,
        out_shape=jax.ShapeDtypeStruct((_NUM_OUT, NR, _LANES), out_dtype),
        grid_spec=pltpu.PrefetchScalarGridSpec(
            num_scalar_prefetch=0,
            grid=grid,
            in_specs=[pl.BlockSpec((_NUM_IN, TR, _LANES), lambda i: (0, i, 0))],
            out_specs=pl.BlockSpec((_NUM_OUT, TR, _LANES), lambda i: (0, i, 0)),
        ),
        compiler_params=pltpu.CompilerParams(
            dimension_semantics=("parallel",),
            vmem_limit_bytes=vmem_limit,
        ),
        cost_estimate=cost,
    )(x3)


def majority_model_forward(x, *, tile_rows=None, out_dtype=None):
    """MajorityModel.forward: x (B, S, 10) -> softmax probabilities (B, S, 5).

    Compatibility wrapper around `majority_channel_major`.  It pays one
    relayout each way (extra HBM passes); callers that can produce/consume the
    channel-major (10, N/128, 128) layout should call `majority_channel_major`
    directly and skip that cost entirely.
    """
    B, S, C = x.shape
    if C != _NUM_IN:
        raise ValueError("MajorityModel expects 10 count channels in the last dim")
    # Softmax probabilities in the input dtype (PyTorch behaviour); integer
    # count inputs would silently truncate to 0/1, so force float32 for them.
    if out_dtype is None:
        out_dtype = x.dtype if jnp.issubdtype(x.dtype, jnp.floating) else jnp.float32
    out_dtype = jnp.dtype(out_dtype)

    N = B * S
    if tile_rows is None:
        tile_rows = _pick_tile_rows(N, x.dtype, out_dtype)
    ts = _round_up(max(int(tile_rows), _MIN_TILE_ROWS), _MIN_TILE_ROWS)
    ts = min(ts, _round_up(N, _MIN_TILE_ROWS))
    n_pad = _round_up(N, ts)

    # Pad rows BEFORE the transpose so XLA can fuse pad + transpose + reshape
    # into a single relayout copy.  Pad rows are all-zero -> softmax stays
    # finite (0.2 each) and is sliced off below.
    xr = x.reshape(N, C)
    if n_pad != N:
        xr = jnp.pad(xr, ((0, n_pad - N), (0, 0)))
    x3 = jnp.transpose(xr).reshape(C, n_pad // _LANES, _LANES)   # (10, NR, 128)

    out3 = majority_channel_major(x3, tile_rows=ts, out_dtype=out_dtype)

    out = out3.reshape(_NUM_OUT, n_pad)[:, :N]                   # (5, N)
    return jnp.transpose(out).reshape(B, S, _NUM_OUT)


def _reference(x):
    """Pure-JAX reference for correctness check."""
    b = x[:, :, 0:4] + x[:, :, 4:8]
    d = x[:, :, 8:9] + x[:, :, 9:10]
    logits = jnp.concatenate([d, b], axis=-1)
    return jax.nn.softmax(logits, axis=-1)


if __name__ == "__main__":
    key = jax.random.PRNGKey(0)
    B, S = 2, 8
    # Count-like features (non-negative), 10 channels per position.
    x = jax.random.uniform(key, (B, S, 10), dtype=jnp.float32, maxval=20.0)

    # Compatibility (PyTorch-layout) path.
    out = jax.block_until_ready(majority_model_forward(x))
    ref = _reference(x)
    assert out.shape == (B, S, 5)
    assert out.dtype == x.dtype
    assert jnp.allclose(out, ref, atol=1e-5, rtol=1e-5)
    assert jnp.allclose(jnp.sum(out, axis=-1), 1.0, atol=1e-5)

    # Preferred channel-major contract (no wrapper relayout) on the same data.
    N = B * S
    n_pad = _round_up(N, _MIN_TILE_ROWS)
    xr = jnp.pad(x.reshape(N, 10), ((0, n_pad - N), (0, 0)))
    x3 = jnp.transpose(xr).reshape(10, n_pad // _LANES, _LANES)
    out3 = jax.block_until_ready(majority_channel_major(x3))
    out_cm = jnp.transpose(out3.reshape(5, n_pad)[:, :N]).reshape(B, S, 5)
    assert jnp.allclose(out_cm, ref, atol=1e-5, rtol=1e-5)

    print("KERNEL_OK")
</pallas_src>

<mosaic_0001>
module attributes {stable_mosaic.version = 11 : i64} {
  func.func @_majority_kernel(%arg0: i32, %arg1: memref<10x8x128xf32, #tpu.memory_space<vmem>>, %arg2: memref<5x8x128xf32, #tpu.memory_space<vmem>>) attributes {dimension_semantics = [#tpu.dimension_semantics<parallel>], iteration_bounds = array<i64: 1>, scalar_prefetch = 0 : i64, scratch_operands = 0 : i64, tpu.core_type = #tpu.core_type<tc>, window_params = [{transform_indices = @transform_0, window_bounds = array<i64: 10, 8, 128>}, {transform_indices = @transform_1, window_bounds = array<i64: 5, 8, 128>}]} {
    %c0 = arith.constant 0 : index
    %c0_0 = arith.constant 0 : index
    %c0_1 = arith.constant 0 : index
    %0 = vector.load %arg1[%c0, %c0_0, %c0_1] : memref<10x8x128xf32, #tpu.memory_space<vmem>>, vector<1x8x128xf32>
    %1 = vector.shape_cast %0 : vector<1x8x128xf32> to vector<8x128xf32>
    %c4 = arith.constant 4 : index
    %c0_2 = arith.constant 0 : index
    %c0_3 = arith.constant 0 : index
    %2 = vector.load %arg1[%c4, %c0_2, %c0_3] : memref<10x8x128xf32, #tpu.memory_space<vmem>>, vector<1x8x128xf32>
    %3 = vector.shape_cast %2 : vector<1x8x128xf32> to vector<8x128xf32>
    %4 = arith.addf %1, %3 : vector<8x128xf32>
    %c1 = arith.constant 1 : index
    %c0_4 = arith.constant 0 : index
    %c0_5 = arith.constant 0 : index
    %5 = vector.load %arg1[%c1, %c0_4, %c0_5] : memref<10x8x128xf32, #tpu.memory_space<vmem>>, vector<1x8x128xf32>
    %6 = vector.shape_cast %5 : vector<1x8x128xf32> to vector<8x128xf32>
    %c5 = arith.constant 5 : index
    %c0_6 = arith.constant 0 : index
    %c0_7 = arith.constant 0 : index
    %7 = vector.load %arg1[%c5, %c0_6, %c0_7] : memref<10x8x128xf32, #tpu.memory_space<vmem>>, vector<1x8x128xf32>
    %8 = vector.shape_cast %7 : vector<1x8x128xf32> to vector<8x128xf32>
    %9 = arith.addf %6, %8 : vector<8x128xf32>
    %c2 = arith.constant 2 : index
    %c0_8 = arith.constant 0 : index
    %c0_9 = arith.constant 0 : index
    %10 = vector.load %arg1[%c2, %c0_8, %c0_9] : memref<10x8x128xf32, #tpu.memory_space<vmem>>, vector<1x8x128xf32>
    %11 = vector.shape_cast %10 : vector<1x8x128xf32> to vector<8x128xf32>
    %c6 = arith.constant 6 : index
    %c0_10 = arith.constant 0 : index
    %c0_11 = arith.constant 0 : index
    %12 = vector.load %arg1[%c6, %c0_10, %c0_11] : memref<10x8x128xf32, #tpu.memory_space<vmem>>, vector<1x8x128xf32>
    %13 = vector.shape_cast %12 : vector<1x8x128xf32> to vector<8x128xf32>
    %14 = arith.addf %11, %13 : vector<8x128xf32>
    %c3 = arith.constant 3 : index
    %c0_12 = arith.constant 0 : index
    %c0_13 = arith.constant 0 : index
    %15 = vector.load %arg1[%c3, %c0_12, %c0_13] : memref<10x8x128xf32, #tpu.memory_space<vmem>>, vector<1x8x128xf32>
    %16 = vector.shape_cast %15 : vector<1x8x128xf32> to vector<8x128xf32>
    %c7 = arith.constant 7 : index
    %c0_14 = arith.constant 0 : index
    %c0_15 = arith.constant 0 : index
    %17 = vector.load %arg1[%c7, %c0_14, %c0_15] : memref<10x8x128xf32, #tpu.memory_space<vmem>>, vector<1x8x128xf32>
    %18 = vector.shape_cast %17 : vector<1x8x128xf32> to vector<8x128xf32>
    %19 = arith.addf %16, %18 : vector<8x128xf32>
    %c8 = arith.constant 8 : index
    %c0_16 = arith.constant 0 : index
    %c0_17 = arith.constant 0 : index
    %20 = vector.load %arg1[%c8, %c0_16, %c0_17] : memref<10x8x128xf32, #tpu.memory_space<vmem>>, vector<1x8x128xf32>
    %21 = vector.shape_cast %20 : vector<1x8x128xf32> to vector<8x128xf32>
    %c9 = arith.constant 9 : index
    %c0_18 = arith.constant 0 : index
    %c0_19 = arith.constant 0 : index
    %22 = vector.load %arg1[%c9, %c0_18, %c0_19] : memref<10x8x128xf32, #tpu.memory_space<vmem>>, vector<1x8x128xf32>
    %23 = vector.shape_cast %22 : vector<1x8x128xf32> to vector<8x128xf32>
    %24 = arith.addf %21, %23 : vector<8x128xf32>
    %25 = arith.maximumf %4, %9 : vector<8x128xf32>
    %26 = arith.maximumf %14, %19 : vector<8x128xf32>
    %27 = arith.maximumf %25, %26 : vector<8x128xf32>
    %28 = arith.maximumf %27, %24 : vector<8x128xf32>
    %29 = arith.subf %24, %28 : vector<8x128xf32>
    %30 = math.exp %29 : vector<8x128xf32>
    %31 = arith.subf %4, %28 : vector<8x128xf32>
    %32 = math.exp %31 : vector<8x128xf32>
    %33 = arith.subf %9, %28 : vector<8x128xf32>
    %34 = math.exp %33 : vector<8x128xf32>
    %35 = arith.subf %14, %28 : vector<8x128xf32>
    %36 = math.exp %35 : vector<8x128xf32>
    %37 = arith.subf %19, %28 : vector<8x128xf32>
    %38 = math.exp %37 : vector<8x128xf32>
    %39 = arith.addf %30, %32 : vector<8x128xf32>
    %40 = arith.addf %34, %36 : vector<8x128xf32>
    %41 = arith.addf %39, %40 : vector<8x128xf32>
    %42 = arith.addf %41, %38 : vector<8x128xf32>
    %43 = tpu.reciprocal %42 {approx = true} : vector<8x128xf32> -> vector<8x128xf32>
    %44 = arith.mulf %42, %43 : vector<8x128xf32>
    %cst = arith.constant 2.000000e+00 : f32
    %45 = vector.broadcast %cst : f32 to vector<8x128xf32>
    %46 = arith.subf %45, %44 : vector<8x128xf32>
    %47 = arith.mulf %43, %46 : vector<8x128xf32>
    %48 = arith.mulf %30, %47 : vector<8x128xf32>
    %c0_20 = arith.constant 0 : index
    %c0_21 = arith.constant 0 : index
    %c0_22 = arith.constant 0 : index
    %49 = vector.load %arg2[%c0_20, %c0_21, %c0_22] : memref<5x8x128xf32, #tpu.memory_space<vmem>>, vector<1x8x128xf32>
    %50 = vector.shape_cast %49 : vector<1x8x128xf32> to vector<8x128xf32>
    %51 = vector.shape_cast %48 : vector<8x128xf32> to vector<1x8x128xf32>
    tpu.vector_store %arg2[%c0_20, %c0_21, %c0_22], %51 {strides = array<i32>} : memref<5x8x128xf32, #tpu.memory_space<vmem>>, vector<1x8x128xf32>,
    %52 = arith.mulf %32, %47 : vector<8x128xf32>
    %c1_23 = arith.constant 1 : index
    %c0_24 = arith.constant 0 : index
    %c0_25 = arith.constant 0 : index
    %53 = vector.load %arg2[%c1_23, %c0_24, %c0_25] : memref<5x8x128xf32, #tpu.memory_space<vmem>>, vector<1x8x128xf32>
    %54 = vector.shape_cast %53 : vector<1x8x128xf32> to vector<8x128xf32>
    %55 = vector.shape_cast %52 : vector<8x128xf32> to vector<1x8x128xf32>
    tpu.vector_store %arg2[%c1_23, %c0_24, %c0_25], %55 {strides = array<i32>} : memref<5x8x128xf32, #tpu.memory_space<vmem>>, vector<1x8x128xf32>,
    %56 = arith.mulf %34, %47 : vector<8x128xf32>
    %c2_26 = arith.constant 2 : index
    %c0_27 = arith.constant 0 : index
    %c0_28 = arith.constant 0 : index
    %57 = vector.load %arg2[%c2_26, %c0_27, %c0_28] : memref<5x8x128xf32, #tpu.memory_space<vmem>>, vector<1x8x128xf32>
    %58 = vector.shape_cast %57 : vector<1x8x128xf32> to vector<8x128xf32>
    %59 = vector.shape_cast %56 : vector<8x128xf32> to vector<1x8x128xf32>
    tpu.vector_store %arg2[%c2_26, %c0_27, %c0_28], %59 {strides = array<i32>} : memref<5x8x128xf32, #tpu.memory_space<vmem>>, vector<1x8x128xf32>,
    %60 = arith.mulf %36, %47 : vector<8x128xf32>
    %c3_29 = arith.constant 3 : index
    %c0_30 = arith.constant 0 : index
    %c0_31 = arith.constant 0 : index
    %61 = vector.load %arg2[%c3_29, %c0_30, %c0_31] : memref<5x8x128xf32, #tpu.memory_space<vmem>>, vector<1x8x128xf32>
    %62 = vector.shape_cast %61 : vector<1x8x128xf32> to vector<8x128xf32>
    %63 = vector.shape_cast %60 : vector<8x128xf32> to vector<1x8x128xf32>
    tpu.vector_store %arg2[%c3_29, %c0_30, %c0_31], %63 {strides = array<i32>} : memref<5x8x128xf32, #tpu.memory_space<vmem>>, vector<1x8x128xf32>,
    %64 = arith.mulf %38, %47 : vector<8x128xf32>
    %c4_32 = arith.constant 4 : index
    %c0_33 = arith.constant 0 : index
    %c0_34 = arith.constant 0 : index
    %65 = vector.load %arg2[%c4_32, %c0_33, %c0_34] : memref<5x8x128xf32, #tpu.memory_space<vmem>>, vector<1x8x128xf32>
    %66 = vector.shape_cast %65 : vector<1x8x128xf32> to vector<8x128xf32>
    %67 = vector.shape_cast %64 : vector<8x128xf32> to vector<1x8x128xf32>
    tpu.vector_store %arg2[%c4_32, %c0_33, %c0_34], %67 {strides = array<i32>} : memref<5x8x128xf32, #tpu.memory_space<vmem>>, vector<1x8x128xf32>,
    return
  }
  func.func @transform_0(%arg0: i32) -> (i32, i32, i32) {
    %c0_i32 = arith.constant 0 : i32
    %c0_i32_0 = arith.constant 0 : i32
    %c0_i32_1 = arith.constant 0 : i32
    return %c0_i32, %arg0, %c0_i32_0 : i32, i32, i32
  }
  func.func @transform_1(%arg0: i32) -> (i32, i32, i32) {
    %c0_i32 = arith.constant 0 : i32
    %c0_i32_0 = arith.constant 0 : i32
    %c0_i32_1 = arith.constant 0 : i32
    return %c0_i32, %arg0, %c0_i32_0 : i32, i32, i32
  }
}

</mosaic_0001>

<bundles_post_ra>
// kernel: tpu_custom_call.1
= control target key start
LH: loop header
LB: loop body
LE: loop exit
PB: predicated region body
PF: predicated region fallthrough
CT: control target
= control target key end

     0   :  { %6 = vsyncpa [#allocation3], 0  ;;  %s213_s0 = inlined_call_operand.hbm [shape: f32[10,8,128], index: 0, kind: input, shape index: {}]   ;;  %s214_s1 = inlined_call_operand.hbm [shape: f32[5,8,128], index: 1, kind: output, shape index: {}]  }
   0x1   :  { %7 = vsyncpa [#allocation4], 0  ;;  %s169_s6 = smov [#allocation2]   ;;  %s121_s10 = scalar_lea.hbm %s213_s0, 1280 }
   0x2   :  { %s13_s7 = sshll.u32 %s169_s6, 4  ;;  %p122_p0 = scmp.ne.s32.totalorder %s213_s0, %s121_s10  ;;  %s14_s7 = int_to_ptr.vmem [resolvable:$true] %s13_s7 }
   0x3   :  { %p125_p1 = scmp.lt.u32.totalorder %s121_s10, %s213_s0 }
   0x5   :  { %p127_p2 = pnand %p125_p1, %p122_p0 }
   0x7   :  { %130 = shalt.err (!%p127_p2)
}
   0x8   :  { %s131_s15 = scalar_lea.vmem %s14_s7, 1280  ;;  %p136_p4 = scmp.lt.s32.totalorder %s14_s7, %s14_s7 }
   0x9   :  { %p132_p3 = scmp.ne.s32.totalorder %s14_s7, %s131_s15  ;;  %p137_p5 = scmp.lt.s32.totalorder %s131_s15, %s131_s15 }
   0xb   :  { %p138_p6 = por %p137_p5, %p136_p4 }
   0xd   :  { %p139_p7 = pnand %p138_p6, %p132_p3 }
   0xf   :  { %142 = shalt.err (!%p139_p7)
}
  0x10   :  { %s170_s16 = smov 128   ;;  %s171_s17 = smov 8  }
  0x11   :  { %19 = dma.hbm_to_vmem [thread:$0]  %s213_s0, 1280, %s14_s7, [#allocation3], %s170_s16, %s170_s16, %s171_s17  }
  0x12   :  { %165 = dma.done.wait [#allocation3], 1280  }
  0x13   :  { %166 = vsyncadd [#allocation3], 4294966016  ;;  %v23_v0 = vld [vmem:[#allocation2] sm:$0xff]  ;;  %v28_v2 = vld [vmem:[#allocation2 + $0x8] sm:$0xff]  ;;  %s172_s0 = smov [#allocation5]  }
  0x14   :  { %v25_v1 = vld [vmem:[#allocation2 + $0x20] sm:$0xff]  ;;  %v30_v4 = vld [vmem:[#allocation2 + $0x28] sm:$0xff]  ;;  %v33_v5 = vld [vmem:[#allocation2 + $0x10] sm:$0xff]  ;;  %s93_s20 = sshll.u32 %s172_s0, 4  ;;  %s94_s20 = int_to_ptr.vmem [resolvable:$true] %s93_s20 }
  0x15   :  { %v26_v3 = vadd.f32 %v25_v1, %v23_v0  ;;  %v35_v6 = vld [vmem:[#allocation2 + $0x30] sm:$0xff]  ;;  %v31_v7 = vadd.f32 %v30_v4, %v28_v2  ;;  %v38_v9 = vld [vmem:[#allocation2 + $0x18] sm:$0xff]  ;;  %v43_v11 = vld [vmem:[#allocation2 + $0x40] sm:$0xff]  ;;  %s143_s21 = scalar_lea.vmem %s94_s20, 640  ;;  %p148_p9 = scmp.lt.s32.totalorder %s94_s20, %s94_s20 }
  0x16   :  { %v36_v8 = vadd.f32 %v35_v6, %v33_v5  ;;  %v40_v10 = vld [vmem:[#allocation2 + $0x38] sm:$0xff]  ;;  %v45_v13 = vld [vmem:[#allocation2 + $0x48] sm:$0xff]  ;;  %p144_p8 = scmp.ne.s32.totalorder %s94_s20, %s143_s21  ;;  %p149_p10 = scmp.lt.s32.totalorder %s143_s21, %s143_s21 }
  0x17   :  { %v41_v12 = vadd.f32 %v40_v10, %v38_v9  ;;  %v47_v14 = vmax.f32 %v26_v3, %v31_v7  ;;  %v46_v15 = vadd.f32 %v45_v13, %v43_v11 }
  0x18   :  { %p150_p11 = por %p149_p10, %p148_p9 }
  0x19   :  { %v48_v16 = vmax.f32 %v36_v8, %v41_v12 }
  0x1a   :  { %p151_p12 = pnand %p150_p11, %p144_p8 }
  0x1b   :  { %v49_v17 = vmax.f32 %v47_v14, %v48_v16 }
  0x1d   :  { %v50_v18 = vmax.f32 %v49_v17, %v46_v15 }
  0x1f   :  { %v51_v19 = vsub.f32 %v46_v15, %v50_v18  ;;  %v54_v20 = vsub.f32 %v26_v3, %v50_v18  ;;  %v57_v21 = vsub.f32 %v31_v7, %v50_v18  ;;  %v60_v22 = vsub.f32 %v36_v8, %v50_v18 }
  0x20   :  { %v63_v23 = vsub.f32 %v41_v12, %v50_v18 }
  0x21   :  { %v52_v24 = vmul.f32 1.442695, %v51_v19  ;;  %v55_v25 = vmul.f32 1.442695, %v54_v20  ;;  %v58_v26 = vmul.f32 1.442695, %v57_v21 }
  0x22   :  { %v61_v27 = vmul.f32 1.442695, %v60_v22  ;;  %v64_v28 = vmul.f32 1.442695, %v63_v23 }
  0x23   :  { %109 = vpow2.f32 %v52_v24 }
  0x24   :  { %111 = vpow2.f32 %v55_v25 }
  0x25   :  { %113 = vpow2.f32 %v58_v26 }
  0x26   :  { %115 = vpow2.f32 %v61_v27 }
  0x27   :  { %117 = vpow2.f32 %v64_v28 }
  0x2d   :  { %v110_v29 = vpop.eup %109 }
  0x2e   :  { %v112_v30 = vpop.eup %111 }
  0x2f   :  { %v114_v31 = vpop.eup %113  ;;  %v66_v32 = vadd.f32 %v112_v30, %v110_v29 }
  0x30   :  { %v116_v33 = vpop.eup %115 }
  0x31   :  { %v67_v34 = vadd.f32 %v116_v33, %v114_v31  ;;  %v118_v35 = vpop.eup %117 }
  0x33   :  { %v68_v36 = vadd.f32 %v67_v34, %v66_v32 }
  0x35   :  { %v69_v37 = vadd.f32 %v118_v35, %v68_v36 }
  0x37   :  { %119 = vrcp.f32 %v69_v37 }
  0x41   :  { %v120_v38 = vpop.eup %119 }
  0x42   :  { %v71_v39 = vmul.f32 %v120_v38, %v69_v37 }
  0x44   :  { %v72_v40 = vsub.f32 2.0, %v71_v39 }
  0x46   :  { %v73_v41 = vmul.f32 %v120_v38, %v72_v40 }
  0x48   :  { %v74_v42 = vmul.f32 %v110_v29, %v73_v41  ;;  %v76_v43 = vmul.f32 %v112_v30, %v73_v41  ;;  %v79_v44 = vmul.f32 %v114_v31, %v73_v41  ;;  %v82_v45 = vmul.f32 %v116_v33, %v73_v41 }
  0x49   :  { %v85_v46 = vmul.f32 %v118_v35, %v73_v41 }
  0x4a   :  { %75 = vst [vmem:[#allocation5] sm:$0xff] %v74_v42  ;;  %78 = vst [vmem:[#allocation5 + $0x8] sm:$0xff] %v76_v43 }
  0x4b   :  { %81 = vst [vmem:[#allocation5 + $0x10] sm:$0xff] %v79_v44  ;;  %84 = vst [vmem:[#allocation5 + $0x18] sm:$0xff] %v82_v45 }
  0x4c   :  { %87 = vst [vmem:[#allocation5 + $0x20] sm:$0xff] %v85_v46 }
  0x4d   :  { %154 = shalt.err (!%p151_p12)
}
  0x4e   :  { %s155_s24 = scalar_lea.hbm %s214_s1, 640 }
  0x4f   :  { %p156_p13 = scmp.ne.s32.totalorder %s214_s1, %s155_s24  ;;  %p159_p0 = scmp.lt.u32.totalorder %s155_s24, %s214_s1 }
  0x51   :  { %p161_p1 = pnand %p159_p0, %p156_p13 }
  0x53   :  { %164 = shalt.err (!%p161_p1)
}
  0x54   :  { %99 = dma.vmem_to_hbm [thread:$0]  %s94_s20, 640, %s214_s1, [#allocation4], %s170_s16, %s170_s16, %s171_s17  }
  0x55   :  { %167 = dma.done.wait [#allocation4], 640  }
  0x56   :  { %168 = vsyncadd [#allocation4], 4294966656 }
  0x57   :  { %103 = vsyncpa [#allocation3], 1 }
  0x58   :  { %104 = vsyncpa [#allocation4], 1 }

</bundles_post_ra>
